<compile_context>
chip_gen: v7x
topology: tpu7x:2x2x1
jax: 0.10.0
libtpu: 0.0.40
codegen_flags: <defaults>
</compile_context>

<pallas_src>
import numpy as np
import jax
import jax.numpy as jnp
from jax import lax
from jax.experimental import pallas as pl
from jax.experimental.pallas import tpu as pltpu


def _round_up(x, m):
    return ((int(x) + m - 1) // m) * m


def _vmem_capacity_bytes():
    """Per-TensorCore VMEM capacity; conservative 64 MiB fallback (v7x floor)."""
    try:
        cap = int(pltpu.get_tpu_info().vmem_capacity_bytes)
        if cap > 0:
            return cap
    except Exception:
        pass
    return 64 * 1024 * 1024


def _make_css_kernel(g, n_rows_valid, inner, apply_mask):
    """Kernel over one group of `g` block-rows per step.

    patch_ref: (3, g, RG, S) f32
    color_ref: (3, g, RC, S) f32, RC in {1, RG}; RC == 1 sublane-broadcasts one color
               row across the RG patch rows of each block-row (structured fast path).
    out_ref:   (1, 8, 128) f32 - per-core scalar partial sum, broadcast lane-dense.
    acc_ref:   (RG, S) f32 resident scratch accumulator.
    """

    def kernel(patch_ref, color_ref, out_ref, acc_ref):
        ci = pl.program_id(0)          # 2-way "parallel" split (v7x TensorCores)
        ii = pl.program_id(1)          # streaming / accumulation axis

        @pl.when(ii == 0)
        def _init():
            acc_ref[...] = jnp.zeros_like(acc_ref)

        # Channel-unrolled squared distance: no (3, g, RG, S) temporary; at most ~3
        # block-sized f32 intermediates live (accounted for in the VMEM budget).
        d = patch_ref[0] - color_ref[0] + 1e-6
        s = d * d
        d = patch_ref[1] - color_ref[1] + 1e-6
        s = s + d * d
        d = patch_ref[2] - color_ref[2] + 1e-6
        s = s + d * d
        dist = jnp.sqrt(s + 1e-6)                      # (g, RG, S)

        if apply_mask:
            # Zero out (a) zero-padded block-rows past the true extent and (b) the
            # duplicated (index-clamped) tail step of the shorter core.  Uses the
            # UNCLAMPED logical step so duplicate steps contribute exactly nothing.
            t = ci * inner + ii
            row = t * g + lax.broadcasted_iota(jnp.int32, (g, 1, 1), 0)
            dist = jnp.where(row < n_rows_valid, dist, 0.0)

        acc_ref[...] += jnp.sum(dist, axis=0)           # (RG, S) lane-wide partials

        @pl.when(ii == inner - 1)
        def _finalize():
            # Finish the reduction in-kernel (one cross-lane reduce per core); the
            # wrapper only adds n_par scalars and divides by numel.
            out_ref[...] = jnp.broadcast_to(jnp.sum(acc_ref[...]), out_ref.shape)

    return kernel


class CSSCalculatorPallas:
    """Pallas replacement for CSSCalculator (color_array fixed at construction)."""

    def __init__(self, color_array, patch_unit=1, step_budget_bytes=None):
        color_np = np.asarray(color_array, dtype=np.float32)
        if color_np.ndim != 4 or color_np.shape[0] != 1 or color_np.shape[1] != 3:
            # The min over dim 0 in the reference is only an identity because that dim
            # has size 1; guard it explicitly so we never silently fold a real min.
            raise ValueError("color_array must have shape (1, 3, S, S)")
        S = int(color_np.shape[2])
        if int(color_np.shape[3]) != S:
            raise ValueError("color_array must be square in its spatial dims")
        self.S = S
        self.numel = float(3 * S * S)

        u = int(patch_unit)
        structured = (
            u > 1
            and S % u == 0
            and np.array_equal(np.repeat(color_np[0, :, ::u, :], u, axis=1), color_np[0])
        )
        if structured:
            # get_color_array() output is constant over groups of `u` rows: stream only
            # one representative color row per block-row (patch_unit-x less color HBM).
            RG, RC = u, 1
            B = S // u
            color_rows = color_np[0, :, ::u, :].reshape(3, B, 1, S)
        else:
            # General fallback (e.g. sample_img branch): stream the full color image.
            RG = 8 if S % 8 == 0 else S
            RC = RG
            B = S // RG
            color_rows = color_np[0].reshape(3, B, RG, S)
        # TODO(synk): general path with S % 8 != 0 collapses to a single (3, S, S)
        #             block; large such shapes would need row padding + masking.

        # ---- tile sizing from PADDED VMEM bytes, generation aware ------------------
        lane = _round_up(S, 128)
        bpr = 3 * _round_up(RG, 8) * lane * 4     # padded patch bytes per block-row
        bcr = 3 * _round_up(RC, 8) * lane * 4     # padded color bytes per block-row
        tmp = 3 * _round_up(RG, 8) * lane * 4     # ~3 live elementwise temporaries
        per_row = 2 * (bpr + bcr) + tmp           # double-buffered inputs + temps

        vmem_cap = _vmem_capacity_bytes()
        if step_budget_bytes is None:
            step_budget_bytes = min(vmem_cap // 2, 32 * 1024 * 1024)
        g_budget = max(1, int(step_budget_bytes) // per_row)

        # Keep >= 2 blocks whenever possible so a 2-TensorCore chip (v7x) splits work.
        half = B if B < 2 else (B + 1) // 2
        g_cap = max(1, min(g_budget, half, B))

        # Prefer a divisor of B (every block full and in-bounds -> no masking, no pad);
        # if B only has tiny divisors, take g = g_cap and zero-pad the block-row axis.
        g_div = 1
        for cand in range(g_cap, 0, -1):
            if B % cand == 0:
                g_div = cand
                break
        if g_div >= max(1, g_cap // 4):
            g = g_div
            B_pad = B
        else:
            g = g_cap
            B_pad = _round_up(B, g)

        total = B_pad // g                              # exact by construction
        n_par = 2 if total >= 2 else 1
        inner = -(-total // n_par)
        apply_mask = (n_par * inner * g != B)           # ragged pad and/or dup step

        if B_pad > B:
            pad = np.zeros((3, B_pad - B, RC, S), dtype=np.float32)
            color_rows = np.concatenate([color_rows, pad], axis=1)

        self._B, self._B_pad, self._RG, self._RC = B, B_pad, RG, RC
        self._g, self._n_par, self._inner = g, n_par, inner
        self._color_rows = jnp.asarray(color_rows)      # (3, B_pad, RC, S)

        def in_idx(c, i):
            # Clamp so the shorter core's duplicated tail step stays in-bounds; its
            # contribution is masked to zero inside the kernel.
            return (0, jnp.minimum(c * inner + i, total - 1), 0, 0)

        patch_spec = pl.BlockSpec((3, g, RG, S), in_idx)
        color_spec = pl.BlockSpec((3, g, RC, S), in_idx)
        out_spec = pl.BlockSpec((1, 8, 128), lambda c, i: (c, 0, 0))

        acc_bytes = _round_up(RG, 8) * lane * 4
        need = g * per_row + acc_bytes + 8 * 1024 * 1024
        vmem_limit = int(min(max(need, 32 * 1024 * 1024), (vmem_cap * 9) // 10))

        self._call = pl.pallas_call(
            _make_css_kernel(g, B, inner, apply_mask),
            out_shape=jax.ShapeDtypeStruct((n_par, 8, 128), jnp.float32),
            grid_spec=pltpu.PrefetchScalarGridSpec(
                num_scalar_prefetch=0,
                grid=(n_par, inner),
                in_specs=[patch_spec, color_spec],
                out_specs=out_spec,
                scratch_shapes=[pltpu.VMEM((RG, S), jnp.float32)],
            ),
            compiler_params=pltpu.CompilerParams(
                dimension_semantics=("parallel", "arbitrary"),
                vmem_limit_bytes=vmem_limit,
            ),
        )

    def __call__(self, adv_patch):
        S = self.S
        if adv_patch.shape != (3, S, S):
            raise ValueError(f"adv_patch must have shape (3, {S}, {S})")
        patch4 = adv_patch.astype(jnp.float32).reshape(3, self._B, self._RG, S)
        if self._B_pad > self._B:
            # Rare awkward-shape fallback: one extra patch copy; padded rows are
            # zero-filled and masked out inside the kernel.
            patch4 = jnp.pad(
                patch4, ((0, 0), (0, self._B_pad - self._B), (0, 0), (0, 0)))
        partial = self._call(patch4, self._color_rows)     # (n_par, 8, 128)
        return jnp.sum(partial[:, 0, 0]) / self.numel


def build_color_array(color_list, side, patch_unit_size):
    """Faithful reimplementation of CSSCalculator.get_color_array (sample_img='')."""
    e_side = np.sqrt(len(color_list))
    assert side / patch_unit_size == e_side, "CSS input error"
    color_imgs = np.zeros([3, side, side], dtype=np.float32)
    row_i = 0
    col_i = 0
    for index, color_triplet in enumerate(color_list):
        red, green, blue = color_triplet
        index_ = index % e_side
        col_i = int(index_ * patch_unit_size)
        if index_ == 0 and index != 0:
            row_i = int(row_i + patch_unit_size)
        color_imgs[0, col_i:col_i + patch_unit_size, row_i:row_i + patch_unit_size] = red
        color_imgs[1, col_i:col_i + patch_unit_size, row_i:row_i + patch_unit_size] = green
        color_imgs[2, col_i:col_i + patch_unit_size, row_i:row_i + patch_unit_size] = blue
    return np.asarray([color_imgs]).astype(np.float32)  # (1, 3, side, side)


def _make_color_array(key, side, patch_unit):
    e_side = side // patch_unit
    triplets = np.asarray(
        jax.random.uniform(key, (e_side * e_side, 3), dtype=jnp.float32))
    color_list = [tuple(float(v) for v in t) for t in triplets]
    return jnp.asarray(build_color_array(color_list, side, patch_unit))


def _reference(patch, carr):
    cd = patch[None] - carr + 1e-6
    cd = jnp.sum(cd ** 2, axis=1) + 1e-6
    cd = jnp.sqrt(cd)
    return jnp.sum(jnp.min(cd, axis=0)) / patch.size


if __name__ == "__main__":
    key = jax.random.PRNGKey(0)
    k_c16, k_p16, k_img, k_c20, k_p20, k_c68, k_p68 = jax.random.split(key, 7)

    # 1) Structured fast path (compressed color stream), S=16, patch_unit=4.
    color16 = _make_color_array(k_c16, 16, 4)
    patch16 = jax.random.uniform(k_p16, (3, 16, 16), dtype=jnp.float32)
    css = CSSCalculatorPallas(color16, patch_unit=4)
    got = jax.block_until_ready(css(patch16))
    ref = jax.block_until_ready(_reference(patch16, color16))
    assert np.allclose(np.asarray(got), np.asarray(ref), rtol=1e-5, atol=1e-6), (
        float(got), float(ref))

    # 2) General fallback path (arbitrary color image, i.e. the sample_img branch).
    arb_color = jax.random.uniform(k_img, (1, 3, 16, 16), dtype=jnp.float32)
    css_gen = CSSCalculatorPallas(arb_color, patch_unit=4)
    got_gen = jax.block_until_ready(css_gen(patch16))
    ref_gen = jax.block_until_ready(_reference(patch16, arb_color))
    assert np.allclose(np.asarray(got_gen), np.asarray(ref_gen), rtol=1e-5, atol=1e-6), (
        float(got_gen), float(ref_gen))

    # 3) Tiny step budget -> g=1, multi-step resident accumulation across both grid axes.
    css_multi = CSSCalculatorPallas(color16, patch_unit=4, step_budget_bytes=1)
    got_multi = jax.block_until_ready(css_multi(patch16))
    assert np.allclose(np.asarray(got_multi), np.asarray(ref), rtol=1e-5, atol=1e-6), (
        float(got_multi), float(ref))

    # 4) Odd block count (B=5): uneven 2-way split -> clamped duplicate step + mask.
    color20 = _make_color_array(k_c20, 20, 4)
    patch20 = jax.random.uniform(k_p20, (3, 20, 20), dtype=jnp.float32)
    css_odd = CSSCalculatorPallas(color20, patch_unit=4)
    got_odd = jax.block_until_ready(css_odd(patch20))
    ref_odd = jax.block_until_ready(_reference(patch20, color20))
    assert np.allclose(np.asarray(got_odd), np.asarray(ref_odd), rtol=1e-5, atol=1e-6), (
        float(got_odd), float(ref_odd))

    # 5) Prime block count (B=17): awkward divisors -> zero-padded block-row axis + mask.
    color68 = _make_color_array(k_c68, 68, 4)
    patch68 = jax.random.uniform(k_p68, (3, 68, 68), dtype=jnp.float32)
    css_pad = CSSCalculatorPallas(color68, patch_unit=4)
    got_pad = jax.block_until_ready(css_pad(patch68))
    ref_pad = jax.block_until_ready(_reference(patch68, color68))
    assert np.allclose(np.asarray(got_pad), np.asarray(ref_pad), rtol=1e-5, atol=1e-6), (
        float(got_pad), float(ref_pad))

    print("KERNEL_OK")
</pallas_src>

<mosaic_0001>
module attributes {stable_mosaic.version = 11 : i64} {
  func.func @kernel(%arg0: i32, %arg1: i32, %arg2: memref<3x2x4x16xf32, #tpu.memory_space<vmem>>, %arg3: memref<3x2x1x16xf32, #tpu.memory_space<vmem>>, %arg4: memref<1x8x128xf32, #tpu.memory_space<vmem>>, %arg5: memref<4x16xf32, #tpu.memory_space<vmem>>) attributes {dimension_semantics = [#tpu.dimension_semantics<parallel>, #tpu.dimension_semantics<arbitrary>], iteration_bounds = array<i64: 2, 1>, scalar_prefetch = 0 : i64, scratch_operands = 1 : i64, tpu.core_type = #tpu.core_type<tc>, window_params = [{transform_indices = @transform_0, window_bounds = array<i64: 3, 2, 4, 16>}, {transform_indices = @transform_1, window_bounds = array<i64: 3, 2, 1, 16>}, {transform_indices = @transform_2, window_bounds = array<i64: 1, 8, 128>}]} {
    %c0_i32 = arith.constant 0 : i32
    %0 = arith.cmpi eq, %arg1, %c0_i32 : i32
    %1 = arith.extui %0 : i1 to i32
    %c0_i32_0 = arith.constant 0 : i32
    %2 = arith.cmpi ne, %1, %c0_i32_0 : i32
    scf.if %2 {
      %cst_32 = arith.constant 0.000000e+00 : f32
      %42 = vector.broadcast %cst_32 : f32 to vector<4x16xf32>
      %c0_33 = arith.constant 0 : index
      %c0_34 = arith.constant 0 : index
      %43 = vector.load %arg5[%c0_33, %c0_34] : memref<4x16xf32, #tpu.memory_space<vmem>>, vector<4x16xf32>
      tpu.vector_store %arg5[%c0_33, %c0_34], %42 {strides = array<i32>} : memref<4x16xf32, #tpu.memory_space<vmem>>, vector<4x16xf32>,
    } else {
    }
    %c0 = arith.constant 0 : index
    %c0_1 = arith.constant 0 : index
    %c0_2 = arith.constant 0 : index
    %c0_3 = arith.constant 0 : index
    %3 = vector.load %arg2[%c0, %c0_1, %c0_2, %c0_3] : memref<3x2x4x16xf32, #tpu.memory_space<vmem>>, vector<1x2x4x16xf32>
    %4 = vector.shape_cast %3 : vector<1x2x4x16xf32> to vector<2x4x16xf32>
    %c0_4 = arith.constant 0 : index
    %c0_5 = arith.constant 0 : index
    %c0_6 = arith.constant 0 : index
    %c0_7 = arith.constant 0 : index
    %5 = vector.load %arg3[%c0_4, %c0_5, %c0_6, %c0_7] : memref<3x2x1x16xf32, #tpu.memory_space<vmem>>, vector<1x2x1x16xf32>
    %6 = vector.shape_cast %5 : vector<1x2x1x16xf32> to vector<2x1x16xf32>
    %7 = vector.broadcast %6 : vector<2x1x16xf32> to vector<2x4x16xf32>
    %8 = arith.subf %4, %7 : vector<2x4x16xf32>
    %cst = arith.constant 9.99999997E-7 : f32
    %9 = vector.broadcast %cst : f32 to vector<2x4x16xf32>
    %10 = arith.addf %8, %9 : vector<2x4x16xf32>
    %11 = arith.mulf %10, %10 : vector<2x4x16xf32>
    %c1 = arith.constant 1 : index
    %c0_8 = arith.constant 0 : index
    %c0_9 = arith.constant 0 : index
    %c0_10 = arith.constant 0 : index
    %12 = vector.load %arg2[%c1, %c0_8, %c0_9, %c0_10] : memref<3x2x4x16xf32, #tpu.memory_space<vmem>>, vector<1x2x4x16xf32>
    %13 = vector.shape_cast %12 : vector<1x2x4x16xf32> to vector<2x4x16xf32>
    %c1_11 = arith.constant 1 : index
    %c0_12 = arith.constant 0 : index
    %c0_13 = arith.constant 0 : index
    %c0_14 = arith.constant 0 : index
    %14 = vector.load %arg3[%c1_11, %c0_12, %c0_13, %c0_14] : memref<3x2x1x16xf32, #tpu.memory_space<vmem>>, vector<1x2x1x16xf32>
    %15 = vector.shape_cast %14 : vector<1x2x1x16xf32> to vector<2x1x16xf32>
    %16 = vector.broadcast %15 : vector<2x1x16xf32> to vector<2x4x16xf32>
    %17 = arith.subf %13, %16 : vector<2x4x16xf32>
    %cst_15 = arith.constant 9.99999997E-7 : f32
    %18 = vector.broadcast %cst_15 : f32 to vector<2x4x16xf32>
    %19 = arith.addf %17, %18 : vector<2x4x16xf32>
    %20 = arith.mulf %19, %19 : vector<2x4x16xf32>
    %21 = arith.addf %11, %20 : vector<2x4x16xf32>
    %c2 = arith.constant 2 : index
    %c0_16 = arith.constant 0 : index
    %c0_17 = arith.constant 0 : index
    %c0_18 = arith.constant 0 : index
    %22 = vector.load %arg2[%c2, %c0_16, %c0_17, %c0_18] : memref<3x2x4x16xf32, #tpu.memory_space<vmem>>, vector<1x2x4x16xf32>
    %23 = vector.shape_cast %22 : vector<1x2x4x16xf32> to vector<2x4x16xf32>
    %c2_19 = arith.constant 2 : index
    %c0_20 = arith.constant 0 : index
    %c0_21 = arith.constant 0 : index
    %c0_22 = arith.constant 0 : index
    %24 = vector.load %arg3[%c2_19, %c0_20, %c0_21, %c0_22] : memref<3x2x1x16xf32, #tpu.memory_space<vmem>>, vector<1x2x1x16xf32>
    %25 = vector.shape_cast %24 : vector<1x2x1x16xf32> to vector<2x1x16xf32>
    %26 = vector.broadcast %25 : vector<2x1x16xf32> to vector<2x4x16xf32>
    %27 = arith.subf %23, %26 : vector<2x4x16xf32>
    %cst_23 = arith.constant 9.99999997E-7 : f32
    %28 = vector.broadcast %cst_23 : f32 to vector<2x4x16xf32>
    %29 = arith.addf %27, %28 : vector<2x4x16xf32>
    %30 = arith.mulf %29, %29 : vector<2x4x16xf32>
    %31 = arith.addf %21, %30 : vector<2x4x16xf32>
    %cst_24 = arith.constant 9.99999997E-7 : f32
    %32 = vector.broadcast %cst_24 : f32 to vector<2x4x16xf32>
    %33 = arith.addf %31, %32 : vector<2x4x16xf32>
    %34 = math.sqrt %33 : vector<2x4x16xf32>
    %c0_25 = arith.constant 0 : index
    %c0_26 = arith.constant 0 : index
    %35 = vector.load %arg5[%c0_25, %c0_26] : memref<4x16xf32, #tpu.memory_space<vmem>>, vector<4x16xf32>
    %cst_27 = arith.constant dense<0.000000e+00> : vector<4x16xf32>
    %36 = vector.multi_reduction <add>, %34, %cst_27 [0] : vector<2x4x16xf32> to vector<4x16xf32>
    %37 = arith.addf %35, %36 : vector<4x16xf32>
    %c0_28 = arith.constant 0 : index
    %c0_29 = arith.constant 0 : index
    %38 = vector.load %arg5[%c0_28, %c0_29] : memref<4x16xf32, #tpu.memory_space<vmem>>, vector<4x16xf32>
    tpu.vector_store %arg5[%c0_28, %c0_29], %37 {strides = array<i32>} : memref<4x16xf32, #tpu.memory_space<vmem>>, vector<4x16xf32>,
    %c0_i32_30 = arith.constant 0 : i32
    %39 = arith.cmpi eq, %arg1, %c0_i32_30 : i32
    %40 = arith.extui %39 : i1 to i32
    %c0_i32_31 = arith.constant 0 : i32
    %41 = arith.cmpi ne, %40, %c0_i32_31 : i32
    scf.if %41 {
      %c0_32 = arith.constant 0 : index
      %c0_33 = arith.constant 0 : index
      %42 = vector.load %arg5[%c0_32, %c0_33] : memref<4x16xf32, #tpu.memory_space<vmem>>, vector<4x16xf32>
      %43 = vector.shape_cast %42 : vector<4x16xf32> to vector<1x4x16xf32>
      %cst_34 = arith.constant dense<0.000000e+00> : vector<1xf32>
      %44 = vector.multi_reduction <add>, %43, %cst_34 [1, 2] : vector<1x4x16xf32> to vector<1xf32>
      %45 = vector.shape_cast %44 : vector<1xf32> to vector<1x1x1xf32>
      %46 = vector.extract %45[0, 0, 0] : f32 from vector<1x1x1xf32>
      %47 = vector.broadcast %46 : f32 to vector<1x8x128xf32>
      %c0_35 = arith.constant 0 : index
      %c0_36 = arith.constant 0 : index
      %c0_37 = arith.constant 0 : index
      %48 = vector.load %arg4[%c0_35, %c0_36, %c0_37] : memref<1x8x128xf32, #tpu.memory_space<vmem>>, vector<1x8x128xf32>
      tpu.vector_store %arg4[%c0_35, %c0_36, %c0_37], %47 {strides = array<i32>} : memref<1x8x128xf32, #tpu.memory_space<vmem>>, vector<1x8x128xf32>,
    } else {
    }
    return
  }
  func.func @transform_0(%arg0: i32, %arg1: i32) -> (i32, i32, i32, i32) {
    %c1_i32 = arith.constant 1 : i32
    %0 = arith.muli %arg0, %c1_i32 : i32
    %1 = arith.addi %0, %arg1 : i32
    %c1_i32_0 = arith.constant 1 : i32
    %2 = arith.minsi %1, %c1_i32_0 : i32
    %c0_i32 = arith.constant 0 : i32
    %c0_i32_1 = arith.constant 0 : i32
    %c0_i32_2 = arith.constant 0 : i32
    %c0_i32_3 = arith.constant 0 : i32
    return %c0_i32, %2, %c0_i32_1, %c0_i32_2 : i32, i32, i32, i32
  }
  func.func @transform_1(%arg0: i32, %arg1: i32) -> (i32, i32, i32, i32) {
    %c1_i32 = arith.constant 1 : i32
    %0 = arith.muli %arg0, %c1_i32 : i32
    %1 = arith.addi %0, %arg1 : i32
    %c1_i32_0 = arith.constant 1 : i32
    %2 = arith.minsi %1, %c1_i32_0 : i32
    %c0_i32 = arith.constant 0 : i32
    %c0_i32_1 = arith.constant 0 : i32
    %c0_i32_2 = arith.constant 0 : i32
    %c0_i32_3 = arith.constant 0 : i32
    return %c0_i32, %2, %c0_i32_1, %c0_i32_2 : i32, i32, i32, i32
  }
  func.func @transform_2(%arg0: i32, %arg1: i32) -> (i32, i32, i32) {
    %c0_i32 = arith.constant 0 : i32
    %c0_i32_0 = arith.constant 0 : i32
    %c0_i32_1 = arith.constant 0 : i32
    return %arg0, %c0_i32, %c0_i32_0 : i32, i32, i32
  }
}

</mosaic_0001>

<bundles_post_ra>
// kernel: tpu_custom_call.1
= control target key start
LH: loop header
LB: loop body
LE: loop exit
PB: predicated region body
PF: predicated region fallthrough
CT: control target
= control target key end

     0   :  { %7 = vsyncpa [#allocation4], 0  ;;  %s1036_s0 = inlined_call_operand.hbm [shape: f32[3,4,4,16], index: 0, kind: input, shape index: {}]   ;;  %s1037_s1 = inlined_call_operand.hbm [shape: f32[3,4,1,16], index: 1, kind: input, shape index: {}]   ;;  %s1038_s2 = inlined_call_operand.hbm [shape: f32[2,8,128], index: 2, kind: output, shape index: {}]  }
   0x1   :  { %9 = vsyncpa [#allocation4 + $0x1], 0 }
   0x2   :  { %10 = vsyncpa [#allocation7], 0 }
   0x3   :  { %12 = vsyncpa [#allocation7 + $0x1], 0 }
   0x4   :  { %13 = vsyncpa [#allocation5], 0 }
   0x5   :  { %15 = vsyncpa [#allocation5 + $0x1], 0  ;;  %s819_s9 = smov 0   ;;  %s821_s10 = smov 0  }
   0x6   :  { %s823_s11 = smov 0   ;;  %s825_s12 = smov 0  }
   0x7   :  { %s827_s13 = smov 0   ;;  %s829_s14 = smov 0  }
   0x8   :  { %s831_s15 = smov 0   ;;  %s833_s16 = smov 0  }
   0x9   :  { %s835_s17 = smov 0  }
   0xa LB: > { %1041 = sst [smem:[#allocation18_spill]] %s784_s16  ;;  %s524_s18 = sadd.s32 4294967295, %s788_s17   ;;  %s788_s17 = sphi %s835_s17, %s21_s17   ;;  %s784_s16 = sphi %s833_s16, %s1048_s16   ;;  %s780_s15 = sphi %s831_s15, %s1047_s15   ;;  %s776_s14 = sphi %s829_s14, %s1054_s14   ;;  %s772_s13 = sphi %s827_s13, %s1053_s13   ;;  %s768_s12 = sphi %s825_s12, %s1052_s12   ;;  %s764_s11 = sphi %s823_s11, %s1051_s11   ;;  %s760_s10 = sphi %s821_s10, %s1050_s10   ;;  %s756_s9 = sphi %s819_s9, %s1049_s9  }
   0xb   : > { %s525_s19 = sadd.s32 4294967294, %s788_s17   ;;  %s33_s20 = sadd.s32 1, %s784_s16 }
   0xc   : > { %p38_p0 = scmp.lt.s32.totalorder %s784_s16, 1  ;;  %p35_p1 = scmp.ge.s32.totalorder %s33_s20, 2 }
   0xd   : > { %s46_s21 = sadd.s32 1, %s776_s14  ;;  %p53_p2 = scmp.ne.s32.totalorder %s776_s14, %s772_s13 }
   0xe   : > { %s868_s22 = scalar_select %p38_p0, %s784_s16, 1 }
   0xf   : > { %s1056_s20 = smov (%p35_p1, %s33_s20), 0  ;;  %p54_p3 = scmp.eq.s32.totalorder %s788_s17, 0 }
  0x10   : > { %1042 = sst [smem:[#allocation19_spill]] %s1056_s20  ;;  %p41_p4 = scmp.lt.s32.totalorder %s1056_s20, 1 }
  0x11   : > { %p59_p5 = scmp.ne.s32.totalorder %s772_s13, %s768_s12  ;;  %p877_p6 = por %p54_p3, %p53_p2 }
  0x12   : > { %p60_p7 = scmp.eq.s32.totalorder %s524_s18, 0  ;;  %s101_s26 = ssub.s32 %s784_s16, %s1056_s20 }
  0x13   : > { %s42_s24 = scalar_select %p41_p4, %s1056_s20, 1 }
  0x14   : > { %p882_p8 = por %p60_p7, %p59_p5  ;;  %p102_p9 = scmp.eq.s32.totalorder %s101_s26, 0 }
  0x15   : > { %s43_s27 = ssub.s32 %s868_s22, %s42_s24  ;;  %s104_s28 = sadd.s32 1, %s764_s11 }
  0x16   : > { %p44_p10 = scmp.eq.s32.totalorder %s43_s27, 0  ;;  %p114_p11 = scmp.ne.s32.totalorder %s764_s11, %s760_s10 }
  0x17   : > { %s891_s29 = scalar_select %p102_p9, %s764_s11, %s104_s28  }
  0x18   : > { %s894_s30 = scalar_select %p44_p10, %s776_s14, %s46_s21  }
  0x19   : > { %p115_p12 = scmp.eq.s32.totalorder %s524_s18, 1  ;;  %p120_p13 = scmp.ne.s32.totalorder %s760_s10, %s756_s9 }
  0x1a   : > { %p121_p0 = scmp.eq.s32.totalorder %s525_s19, 1  ;;  %p527_p3 = scmp.ge.s32.totalorder %s788_s17, 2 }
  0x1b   : > { %p900_p1 = por %p115_p12, %p114_p11 }
  0x1c   : > { %p904_p2 = por %p121_p0, %p120_p13  ;;  %137 = sbr.rel (%p527_p3) target bundleno = 62 (0x3e), region = 16 }
  0x23   : > { %s912_s5 = sand.u32 1, %s776_s14   ;;  %s556_s7 = sshll.u32 %s868_s22, 7 }
  0x24   : > { %s558_s6 = smul.u32 24, %s912_s5  ;;  %s790_s8 = smov 256  }
  0x25   : > { %565 = sst [smem:[#allocation10]] (%p877_p6), %s790_s8  ;;  %s154_s21 = scalar_lea.hbm %s1036_s0, %s556_s7 }
  0x26   : > { %s564_s12 = scalar_select %p877_p6, [#allocation0], [#allocation13] }
  0x27   : > { %s145_s26 = scalar_lea.vmem [#allocation3], %s558_s6  ;;  %s791_s28 = smov 128  }
  0x28   : > { %s159_s24 = sld [smem:[%s564_s12]]   ;;  %s167_s27 = sshll.u32 %s145_s26, 4  ;;  %s168_s27 = int_to_ptr.vmem [resolvable:$true] %s167_s27 }
  0x29   : > { %566 = sst [smem:[#allocation10 + $0x1]] (%p877_p6), %s791_s28  ;;  %s792_s20 = smov 2  }
  0x2a   : > { %567 = sst [smem:[#allocation10 + $0x2]] (%p877_p6), %s792_s20  ;;  %s793_s16 = smov 64  }
  0x2b   : > { %568 = sst [smem:[#allocation10 + $0x3]] (%p877_p6), %s793_s16  ;;  %s794_s8 = smov 4  }
  0x2c   : > { %569 = sst [smem:[#allocation10 + $0x4]] (%p877_p6), %s793_s16  ;;  %s142_s6 = scalar_lea.sflag [#allocation4], %s912_s5 }
  0x2d   : > { %570 = sst [smem:[#allocation10 + $0x5]] (%p877_p6), %s794_s8  ;;  %s795_s18 = smov [#allocation9]  }
  0x2e   : > { %s530_s7 = sshll.u32 %s159_s24, 26 }
  0x2f   : > { %s531_s12 = sadd.s32 134217728, %s530_s7 }
  0x30   : > { %571 = dma.general (%p877_p6), %s154_s21, 384, %s168_s27, %s142_s6, %s795_s18, [#allocation10], %s531_s12, 0  }
  0x31   : > { %s559_s20 = smul.u32 6, %s912_s5  ;;  %s557_s19 = sshll.u32 %s868_s22, 5 }
  0x32   : > { %s572_s16 = scalar_select %p877_p6, [#allocation0], [#allocation14] }
  0x33   : > { %s203_s24 = scalar_lea.hbm %s1037_s1, %s557_s19  ;;  %s796_s8 = smov 64  }
  0x34   : > { %573 = sst [smem:[#allocation12]] (%p877_p6), %s796_s8  ;;  %s194_s27 = scalar_lea.vmem [#allocation6], %s559_s20 }
  0x35   : > { %s208_s21 = sld [smem:[%s572_s16]]   ;;  %s216_s7 = sshll.u32 %s194_s27, 4  ;;  %s217_s7 = int_to_ptr.vmem [resolvable:$true] %s216_s7 }
  0x36   : > { %s797_s12 = smov 32   ;;  %s798_s6 = smov 2  }
  0x37   : > { %574 = sst [smem:[#allocation12 + $0x1]] (%p877_p6), %s797_s12  ;;  %s799_s22 = smov 16  }
  0x38   : > { %575 = sst [smem:[#allocation12 + $0x2]] (%p877_p6), %s798_s6  ;;  %s800_s19 = smov 1  }
  0x39   : > { %576 = sst [smem:[#allocation12 + $0x3]] (%p877_p6), %s799_s22  ;;  %s191_s20 = scalar_lea.sflag [#allocation7], %s912_s5 }
  0x3a   : > { %577 = sst [smem:[#allocation12 + $0x4]] (%p877_p6), %s799_s22  ;;  %s801_s26 = smov [#allocation11]  }
  0x3b   : > { %s534_s18 = sshll.u32 %s208_s21, 26  ;;  %578 = sst [smem:[#allocation12 + $0x5]] (%p877_p6), %s800_s19 }
  0x3c   : > { %s535_s16 = sadd.s32 134217728, %s534_s18 }
  0x3d   : > { %579 = dma.general (%p877_p6), %s203_s24, 96, %s217_s7, %s191_s20, %s801_s26, [#allocation12], %s535_s16, 0  }
  0x3e PF: > { %p536_p4 = scmp.ge.s32.totalorder %s788_s17, 1  ;;  %p237_p5 = scmp.lt.s32.totalorder %s788_s17, 3 }
  0x40   : > { %p238_p7 = pnand %p536_p4, %p237_p5 }
  0x41   : > { %s243_s28 = sand.u32 (!%p238_p7), 1, %s772_s13  }
  0x42   : > { %241 = sbr.rel (%p238_p7) target bundleno = 343 (0x157), region = 28  ;;  %s244_s21 = scalar_lea.sflag (!%p238_p7), [#allocation4], %s243_s28 }
  0x43   : > { %s560_s8 = smul.u32 (!%p238_p7), 24, %s243_s28 }
  0x45   : > { %s247_s27 = scalar_lea.vmem (!%p238_p7), [#allocation3], %s560_s8 }
  0x49   : > { %743 = dma.done.wait (%p882_p8), %s244_s21, 384  }
  0x4a   : > { %745 = vsyncadd (%p882_p8), %s244_s21, 4294966912  ;;  %s561_s23 = smul.u32 6, %s243_s28  ;;  %s253_s5 = scalar_lea.sflag [#allocation7], %s243_s28 }
  0x4c   : > { %s256_s24 = scalar_lea.vmem [#allocation6], %s561_s23 }
  0x4d   : > { %747 = dma.done.wait (%p882_p8), %s253_s5, 96  }
  0x4e   : > { %749 = vsyncadd (%p882_p8), %s253_s5, 4294967200  ;;  %vm294_vm0 = vcmask 125952   ;;  %v802_v0 = vmov 0.0   ;;  %v296_v1 = vld [vmem:[%s247_s27] sm:$0xf]  ;;  %s279_s25 = sand.u32 1, %s760_s10  }
  0x4f   : > { %295 = vst.msk [vmem:[#allocation2] sm:$0xf] %vm294_vm0, %v802_v0  ;;  %v297_v2 = vld [vmem:[%s247_s27 + $0x4] sm:$0xf]  ;;  %v538_v3 = vld [vmem:[%s256_s24] ss:$0 sm:$0xff] }
  0x50   : > { %v539_v4 = vld [vmem:[%s256_s24 + $0x1] ss:$0 sm:$0xff]  ;;  %v312_v5 = vsub.f32 %v296_v1, %v538_v3  ;;  %v540_v6 = vld [vmem:[%s247_s27 + $0x8] sm:$0xf]  ;;  %v541_v7 = vld [vmem:[%s247_s27 + $0xc] sm:$0xf] }
  0x51   : > { %v313_v8 = vsub.f32 %v297_v2, %v539_v4  ;;  %v544_v9 = vld [vmem:[%s256_s24 + $0x2] ss:$0 sm:$0xff]  ;;  %v545_v10 = vld [vmem:[%s256_s24 + $0x3] ss:$0 sm:$0xff]  ;;  %v547_v15 = vld [vmem:[%s247_s27 + $0x14] sm:$0xf] }
  0x52   : > { %v546_v11 = vld [vmem:[%s247_s27 + $0x10] sm:$0xf]  ;;  %v314_v12 = vadd.f32 1e-06, %v312_v5  ;;  %v336_v13 = vsub.f32 %v540_v6, %v544_v9  ;;  %v337_v14 = vsub.f32 %v541_v7, %v545_v10  ;;  %v550_v16 = vld [vmem:[%s256_s24 + $0x4] ss:$0 sm:$0xff] }
  0x53   : > { %v315_v17 = vadd.f32 1e-06, %v313_v8  ;;  %v551_v18 = vld [vmem:[%s256_s24 + $0x5] ss:$0 sm:$0xff]  ;;  %v362_v19 = vsub.f32 %v546_v11, %v550_v16  ;;  %s537_s7 = sshll.u32 %s279_s25, 3  ;;  %s553_s22 = sshll.u32 %s780_s15, 7 }
  0x54   : > { %v316_v20 = vmul.f32 %v314_v12, %v314_v12  ;;  %v338_v21 = vadd.f32 1e-06, %v336_v13  ;;  %v339_v22 = vadd.f32 1e-06, %v337_v14  ;;  %v363_v23 = vsub.f32 %v547_v15, %v551_v18  ;;  %s281_s12 = scalar_lea.vmem [#allocation8], %s537_s7  ;;  %s981_s20 = scalar_lea.hbm %s1038_s2, %s553_s22 }
  0x55   : > { %v317_v24 = vmul.f32 %v315_v17, %v315_v17  ;;  %v364_v25 = vadd.f32 1e-06, %v362_v19  ;;  %s423_s6 = sshll.u32 %s281_s12, 4  ;;  %s410_s26 = scalar_lea.sflag [#allocation5], %s279_s25  ;;  %s976_s6 = int_to_ptr.vmem [resolvable:$true] %s423_s6 }
  0x56   : > { %v340_v26 = vmul.f32 %v338_v21, %v338_v21  ;;  %v341_v27 = vmul.f32 %v339_v22, %v339_v22  ;;  %v365_v28 = vadd.f32 1e-06, %v363_v23  ;;  %v386_v48 = vld [vmem:[#allocation2] sm:$0xf]  ;;  %s678_s28 = scalar_lea.vmem %s976_s6, 128  ;;  %s803_s15 = smov [#allocation8]  }
  0x57   : > { %v366_v29 = vmul.f32 %v364_v25, %v364_v25  ;;  %p679_p6 = scmp.ne.s32.totalorder %s976_s6, %s678_s28  ;;  %s682_s8 = sshll.u32 %s803_s15, 4  ;;  %s683_s8 = int_to_ptr.vmem [resolvable:$false] %s682_s8 }
  0x58   : > { %v342_v30 = vadd.f32 %v340_v26, %v316_v20  ;;  %v343_v31 = vadd.f32 %v341_v27, %v317_v24  ;;  %v367_v32 = vmul.f32 %v365_v28, %v365_v28  ;;  %s684_s21 = scalar_lea.vmem %s683_s8, 256  ;;  %p685_p10 = scmp.lt.s32.totalorder %s976_s6, %s683_s8 }
  0x59   : > { %p680_p8 = pnand %p679_p6, %p900_p1  ;;  %p686_p11 = scmp.lt.s32.totalorder %s684_s21, %s678_s28 }
  0x5a   : > { %v368_v33 = vadd.f32 %v366_v29, %v342_v30  ;;  %v369_v34 = vadd.f32 %v367_v32, %v343_v31 }
  0x5b   : > { %p681_p9 = pneg %p680_p8  ;;  %p687_p12 = por %p686_p11, %p685_p10 }
  0x5c   : > { %v370_v35 = vadd.f32 1e-06, %v368_v33  ;;  %v371_v36 = vadd.f32 1e-06, %v369_v34 }
  0x5d   : > { %p688_p13 = pnand %p687_p12, %p681_p9 }
  0x5e   : > { %674 = vrsqrt.f32 %v370_v35  ;;  %vm374_vm1 = vcmp.eq.f32.partialorder %v370_v35, inf  ;;  %v377_v38 = vand.u32 2147483648, %v370_v35  ;;  %vm376_vm2 = vcmp.eq.f32.partialorder %v370_v35, 0.0 }
  0x5f   : > { %676 = vrsqrt.f32 %v371_v36  ;;  %vm381_vm3 = vcmp.eq.f32.partialorder %v371_v36, inf  ;;  %v384_v41 = vand.u32 2147483648, %v371_v36  ;;  %vm383_vm4 = vcmp.eq.f32.partialorder %v371_v36, 0.0 }
  0x68   : > { %v675_v37 = vpop.eup %674 }
  0x69   : > { %v677_v39 = vpop.eup %676  ;;  %v373_v40 = vmul.f32 %v675_v37, %v370_v35 }
  0x6a   : > { %v380_v42 = vmul.f32 %v677_v39, %v371_v36 }
  0x6b   : > { %v375_v43 = vsel %vm374_vm1, %v370_v35, %v373_v40 }
  0x6c   : > { %v378_v44 = vsel %vm376_vm2, %v377_v38, %v375_v43  ;;  %v382_v45 = vsel %vm381_vm3, %v371_v36, %v380_v42 }
  0x6d   : > { %v385_v46 = vsel %vm383_vm4, %v384_v41, %v382_v45  ;;  %v388_v47 = vsel %vm294_vm0, %v378_v44, 0.0 }
  0x6e   : > { %v389_v49 = vsel %vm294_vm0, %v385_v46, 0.0 }
  0x6f   : > { %v390_v50 = vadd.f32 %v389_v49, %v388_v47 }
  0x71   : > { %v391_v51 = vadd.f32 %v390_v50, %v386_v48 }
  0x73   : > { %392 = vst.msk [vmem:[#allocation2] sm:$0xf] %vm294_vm0, %v391_v51 }
  0x7a   : > { %v396_v52 = vld [vmem:[#allocation2] sm:$0xf] }
  0x7b   : > { %v397_v53 = vsel %vm294_vm0, %v396_v52, 0.0 }
  0x7c   : > { %398 = vadd.xlane.f32.xlu0 %v397_v53 }
 0x109   : > { %v399_v54 = vpop.xlane.xlu0 %398 }
 0x10a   : > { %v400_v55 = vrot.slane %v399_v54, 4 }
 0x10c   : > { %v401_v56 = vadd.f32 %v400_v55, %v399_v54 }
 0x10e   : > { %v402_v57 = vrot.slane %v401_v56, 2 }
 0x110   : > { %v403_v58 = vadd.f32 %v402_v57, %v401_v56 }
 0x112   : > { %v404_v59 = vrot.slane %v403_v58, 1 }
 0x114   : > { %v405_v60 = vadd.f32 %v404_v59, %v403_v58 }
 0x116   : > { %562 = vpush %v405_v60 }
 0x147   : > { %s563_s18 = spop %562 }
 0x148   : > { %v407_v61 = vstv %s563_s18 }
 0x149   : > { %408 = vst [vmem:[%s281_s12] sm:$0xff] %v407_v61 }
 0x14a   : > { %691 = shalt.err (!%p688_p13)
}
 0x14b   : > { %s692_s27 = scalar_lea.hbm %s981_s20, 128  ;;  %s696_s24 = scalar_lea.hbm %s1038_s2, 256 }
 0x14c   : > { %p693_p0 = scmp.ne.s32.totalorder %s981_s20, %s692_s27  ;;  %p697_p7 = scmp.lt.u32.totalorder %s981_s20, %s1038_s2 }
 0x14d   : > { %p698_p6 = scmp.lt.u32.totalorder %s696_s24, %s692_s27  ;;  %p700_p9 = scmp.lt.u32.totalorder %s692_s27, %s981_s20 }
 0x14e   : > { %p694_p4 = pnand %p693_p0, %p900_p1 }
 0x14f   : > { %p699_p8 = por %p698_p6, %p697_p7 }
 0x150   : > { %p695_p5 = pneg %p694_p4 }
 0x151   : > { %p701_p10 = por %p700_p9, %p699_p8 }
 0x153   : > { %p702_p11 = pnand %p701_p10, %p695_p5 }
 0x155   : > { %705 = shalt.err (!%p702_p11)
}
 0x156   : > { %582 = dma.vmem_to_hbm [thread:$0]  (%p900_p1), %s976_s6, 128, %s981_s20, %s410_s26  }
 0x157 PF: > { %s435_s12 = sand.u32 1, %s756_s9   ;;  %p585_p12 = pnand %p527_p3, %p904_p2 }
 0x158   : > { %s436_s22 = scalar_lea.sflag [#allocation5], %s435_s12 }
 0x159   : > { %751 = dma.done.wait (!%p585_p12), %s436_s22, 128  }
 0x15a   : > { %753 = vsyncadd (!%p585_p12), %s436_s22, 4294967168  ;;  %s21_s17 = sadd.s32 1, %s788_s17   ;;  %s1047_s15 = sld [smem:[#allocation18_spill]] }
 0x15b   : > { %p18_p13 = scmp.ge.s32.totalorder %s21_s17, 4   ;;  %s1048_s16 = sld [smem:[#allocation19_spill]] }
 0x15c   : > { %s1049_s9 = smov %s760_s10  ;;  %s1050_s10 = smov %s764_s11 }
 0x15d   : > { %s1051_s11 = smov %s891_s29  ;;  %s1052_s12 = smov %s772_s13 }
 0x15e   : > { %s1053_s13 = smov %s776_s14  ;;  %s1054_s14 = smov %s894_s30 }
 0x15f   :  { %20 = sbr.rel (!%p18_p13) target bundleno = 10 (0xa), region = 108 }
 0x166   :  { %441 = vsyncpa [#allocation4], 1 }
 0x167   :  { %443 = vsyncpa [#allocation4 + $0x1], 1 }
 0x168   :  { %444 = vsyncpa [#allocation7], 1 }
 0x169   :  { %446 = vsyncpa [#allocation7 + $0x1], 1 }
 0x16a   :  { %447 = vsyncpa [#allocation5], 1 }
 0x16b   :  { %449 = vsyncpa [#allocation5 + $0x1], 1 }

</bundles_post_ra>
